<compile_context>
chip_gen: v6e
topology: v6e:2x2x1
jax: 0.10.0
libtpu: 0.0.40
codegen_flags: <defaults>
</compile_context>

<pallas_src>
import functools
import math

import jax
import jax.numpy as jnp
from jax.experimental import pallas as pl
from jax.experimental.pallas import tpu as pltpu

_LANES = 128


# --------------------------------------------------------------------------- #
# Generation-aware VMEM budget
# --------------------------------------------------------------------------- #
def _vmem_capacity_bytes():
    try:
        info = pltpu.get_tpu_info()
        cap = int(getattr(info, "vmem_capacity_bytes", 0))
        if cap > 0:
            return cap
    except Exception:
        pass
    return 64 * 1024 * 1024  # conservative default (v7x per-core VMEM)


# --------------------------------------------------------------------------- #
# One-time pre-normalization (tiny O(N*D) mem-bound pass)
# --------------------------------------------------------------------------- #
def _prenormalize(emb_i, emb_j, *, inv_t, normalize, eps):
    """L2-normalize rows (cosine path) and fold sqrt(1/T) into each row so the
    MXU product of reps_n @ reps_n.T is already sim / temperature.  Also
    returns the per-pair positive similarity (already / T)."""
    zi = emb_i.astype(jnp.float32)
    zj = emb_j.astype(jnp.float32)
    sqrt_inv_t = float(inv_t) ** 0.5

    def scale(x):
        if normalize:
            ssq = jnp.sum(x * x, axis=-1, keepdims=True)
            return x * (jax.lax.rsqrt(jnp.maximum(ssq, eps * eps)) * sqrt_inv_t)
        return x * sqrt_inv_t

    zi_n = scale(zi)
    zj_n = scale(zj)
    pos_half = jnp.sum(zi_n * zj_n, axis=-1)            # (B,)  sim(i, pair)/T
    reps_n = jnp.concatenate([zi_n, zj_n], axis=0)      # (2B, D)
    return reps_n, pos_half


# --------------------------------------------------------------------------- #
# Flash-style row/col-tiled exp-row-sum kernel (the N^2*D work)
# --------------------------------------------------------------------------- #
def _ntxent_sumexp_kernel(q_ref, k_ref, o_ref, *, inv_t, tk):
    """Accumulate, per query row, sum_j exp(sim_ij/T - 1/T) over the key tile.

    The (2B, 2B) similarity matrix is never materialized.  Rows are already
    normalized with sqrt(1/T) folded in, so the bf16 MXU output is sim/T.
    The constant 1/T shift bounds exp by 1 (no online max, no f32 overflow at
    small temperatures).  Accumulation is lane-dense: the tk columns are folded
    into 128 lanes with VPU adds; the accumulator is the resident (tq, 128)
    f32 output block, and the single cross-lane reduce happens in the wrapper.
    """
    @pl.when(pl.program_id(1) == 0)
    def _():
        o_ref[...] = jnp.zeros_like(o_ref)

    dn = (((1,), (1,)), ((), ()))            # contract dim 1 of both operands
    s = jax.lax.dot_general(q_ref[...], k_ref[...], dn,
                            preferred_element_type=jnp.float32)   # (tq, tk) f32
    e = jnp.exp(s - inv_t)                                        # <= 1.0
    folded = e[:, 0:_LANES]                  # lane-aligned static slices -> VPU adds
    for c in range(1, tk // _LANES):
        folded = folded + e[:, c * _LANES:(c + 1) * _LANES]
    o_ref[...] += folded


def _choose_col_tile(n_pad, d, tq, mm_bytes, budget_bytes):
    """Largest tk (multiple of 128, divisor of n_pad) whose pipelined working
    set (double-buffered streams + f32 sim/exp intermediates) fits the budget."""
    for nk in range(1, n_pad // _LANES + 1):
        if n_pad % nk:
            continue
        tk = n_pad // nk
        if tk % _LANES:
            continue
        need = (2 * tk * d * mm_bytes        # double-buffered key stream
                + 2 * tq * d * mm_bytes      # double-buffered query stream
                + 2 * tq * _LANES * 4        # double-buffered f32 output acc
                + 2 * tq * tk * 4)           # f32 similarity + exp intermediates
        if need <= budget_bytes:
            return tk
    return _LANES                            # n_pad is always a multiple of 128


def _ntxent_loss_tiled(emb_i, emb_j, *, temperature, block_rows=256,
                       mm_dtype=jnp.bfloat16, eps=1e-8):
    """Cosine-similarity NT-Xent for large batches; never materializes (2B,2B)."""
    B, D = emb_i.shape
    N = 2 * B
    inv_t = 1.0 / float(temperature)

    reps_n, pos_half = _prenormalize(emb_i, emb_j, inv_t=inv_t,
                                     normalize=True, eps=eps)

    # Row tile: keep nq >= 2 so the "parallel" axis shards across v7x's two TCs.
    tq = int(block_rows)
    if N < 2 * tq:
        tq = _LANES
    n_pad_total = (N + tq - 1) // tq * tq
    nq = n_pad_total // tq
    n_pad_rows = n_pad_total - N

    # Generation-aware VMEM budget: ~48 MiB on v7x (64 MiB VMEM),
    # capped at ~100 MiB on v5e/v6e (128 MiB VMEM).
    vmem_cap = _vmem_capacity_bytes()
    vmem_limit = max(32 * 1024 * 1024,
                     min(int(vmem_cap * 3 // 4), 100 * 1024 * 1024))
    budget = int(vmem_limit * 0.8)           # headroom for Mosaic internals

    mm_bytes = jnp.dtype(mm_dtype).itemsize
    tk = _choose_col_tile(n_pad_total, D, tq, mm_bytes, budget)
    nk = n_pad_total // tk

    reps_mm = reps_n
    if n_pad_rows:
        reps_mm = jnp.pad(reps_mm, ((0, n_pad_rows), (0, 0)))   # zero rows
    reps_mm = reps_mm.astype(mm_dtype)

    kernel = functools.partial(_ntxent_sumexp_kernel, inv_t=inv_t, tk=tk)

    # TODO(synk): on v5e, if the key-stream DMA ever shows up exposed at very
    # large D, bump the key BlockSpec with pipeline_mode=pl.Buffered(3).
    sum_exp = pl.pallas_call(
        kernel,
        out_shape=jax.ShapeDtypeStruct((n_pad_total, _LANES), jnp.float32),
        grid=(nq, nk),
        in_specs=[pl.BlockSpec((tq, D), lambda qi, ki: (qi, 0)),   # query rows
                  pl.BlockSpec((tk, D), lambda qi, ki: (ki, 0))],  # key rows
        out_specs=pl.BlockSpec((tq, _LANES), lambda qi, ki: (qi, 0)),
        compiler_params=pltpu.CompilerParams(
            dimension_semantics=("parallel", "arbitrary"),
            vmem_limit_bytes=vmem_limit),
    )(reps_mm, reps_mm)

    # Cheap O(N) epilogue (outside the N^2 kernel):
    #   S_i  = sum over ALL columns (incl. self & zero-padded) of exp(sim/T - 1/T)
    #   den  = S_i - n_pad*exp(-1/T) - 1          (padded columns & self term)
    #   loss = mean_i [ 1/T + log(den_i) - pos_i ]
    s_rows = jnp.sum(sum_exp[:N], axis=1)
    den = s_rows - (float(n_pad_rows) * math.exp(-inv_t) + 1.0)
    loss = inv_t + (jnp.sum(jnp.log(den)) - 2.0 * jnp.sum(pos_half)) / N
    return loss


# --------------------------------------------------------------------------- #
# Single-block kernel (small 2B: whole problem resident in VMEM)
# --------------------------------------------------------------------------- #
def _ntxent_small_kernel(emb_i_ref, emb_j_ref, o_ref, *, batch_size, inv_t,
                         normalize, eps):
    B = batch_size
    zi = emb_i_ref[...].astype(jnp.float32)
    zj = emb_j_ref[...].astype(jnp.float32)
    sqrt_inv_t = float(inv_t) ** 0.5

    def scale_rows(x):
        if normalize:
            ssq = jnp.sum(x * x, axis=1, keepdims=True)
            return x * (jax.lax.rsqrt(jnp.maximum(ssq, eps * eps)) * sqrt_inv_t)
        return x * sqrt_inv_t

    zi_s = scale_rows(zi)
    zj_s = scale_rows(zj)

    # positive similarity per pair (already includes 1/T); identical in both halves
    pos_half = jnp.sum(zi_s * zj_s, axis=1, keepdims=True)          # (B, 1)
    positives = jnp.concatenate([pos_half, pos_half], axis=0)       # (2B, 1)

    reps = jnp.concatenate([zi_s, zj_s], axis=0)                    # (2B, D)
    dn = (((1,), (1,)), ((), ()))
    sim = jax.lax.dot_general(reps, reps, dn,
                              preferred_element_type=jnp.float32)   # (2B, 2B)
    self_sim = jnp.sum(reps * reps, axis=1, keepdims=True)          # (2B, 1)

    if normalize:
        # |sim/T| <= 1/T: constant shift by 1/T keeps exp <= 1 (no overflow at
        # small temperatures, no per-row max pass needed).
        row_sum = jnp.sum(jnp.exp(sim - inv_t), axis=1, keepdims=True)
        den = row_sum - jnp.exp(self_sim - inv_t)
        loss_rows = jnp.log(den) + inv_t - positives
    else:
        # dot similarity is unbounded -> per-row max stabilization
        m = jnp.max(sim, axis=1, keepdims=True)
        row_sum = jnp.sum(jnp.exp(sim - m), axis=1, keepdims=True)
        den = row_sum - jnp.exp(self_sim - m)
        loss_rows = jnp.log(den) + m - positives

    o_ref[...] = jnp.sum(loss_rows, axis=0, keepdims=True) * (0.5 / B)


def _ntxent_loss_small(emb_i, emb_j, *, temperature, use_cosine_similarity=True):
    B, D = emb_i.shape
    kernel = functools.partial(
        _ntxent_small_kernel, batch_size=B, inv_t=1.0 / float(temperature),
        normalize=bool(use_cosine_similarity), eps=1e-8)
    out = pl.pallas_call(
        kernel,
        out_shape=jax.ShapeDtypeStruct((1, 1), jnp.float32),
        in_specs=[pl.BlockSpec((B, D), lambda: (0, 0)),
                  pl.BlockSpec((B, D), lambda: (0, 0))],
        out_specs=pl.BlockSpec((1, 1), lambda: (0, 0)),
    )(emb_i, emb_j)
    return out[0, 0]


# --------------------------------------------------------------------------- #
# Dispatcher
# --------------------------------------------------------------------------- #
def ntxent_loss(emb_i, emb_j, *, temperature=0.5, use_cosine_similarity=True,
                block_rows=256, min_tiled_rows=1024, mm_dtype=jnp.bfloat16):
    assert emb_i.shape == emb_j.shape and emb_i.ndim == 2
    B, _ = emb_i.shape
    N = 2 * B
    if use_cosine_similarity and N >= min_tiled_rows:
        # Arbitrary B handled via zero-row padding inside the tiled path; no
        # pathological tiny-tile fallback anymore.
        return _ntxent_loss_tiled(emb_i, emb_j, temperature=temperature,
                                  block_rows=block_rows, mm_dtype=mm_dtype)
    # TODO(synk): a large-batch dot-similarity (use_cosine_similarity=False)
    # variant needs an online-max tiled kernel; it falls back to the monolithic
    # kernel here.
    return _ntxent_loss_small(emb_i, emb_j, temperature=temperature,
                              use_cosine_similarity=use_cosine_similarity)


# --------------------------------------------------------------------------- #
# Pure-JAX reference mirroring the PyTorch module (mask + CrossEntropy form)
# --------------------------------------------------------------------------- #
def _reference_ntxent(emb_i, emb_j, temperature, use_cosine_similarity=True):
    B = emb_i.shape[0]
    N = 2 * B
    reps = jnp.concatenate([emb_j, emb_i], axis=0)     # PyTorch order: [zjs, zis]
    if use_cosine_similarity:
        nrm = jnp.linalg.norm(reps, axis=1, keepdims=True)
        reps_n = reps / jnp.maximum(nrm, 1e-12)
        sim = reps_n @ reps_n.T
    else:
        sim = reps @ reps.T
    l_pos = jnp.diagonal(sim, offset=B)
    r_pos = jnp.diagonal(sim, offset=-B)
    positives = jnp.concatenate([l_pos, r_pos])                        # (N,)
    keep = 1.0 - (jnp.eye(N) + jnp.eye(N, k=B) + jnp.eye(N, k=-B))     # negatives mask
    neg_logits = jnp.where(keep.astype(bool), sim / temperature, -jnp.inf)
    row_logits = jnp.concatenate([positives[:, None] / temperature, neg_logits], axis=1)
    lse = jax.nn.logsumexp(row_logits, axis=1)
    loss = jnp.sum(lse - positives / temperature)       # CE(label=0, reduction='sum')
    return loss / N


if __name__ == "__main__":
    temperature = 0.5
    key = jax.random.PRNGKey(0)
    k1, k2, k3, k4 = jax.random.split(key, 4)

    # --- small shape: exercises the single-block kernel -------------------- #
    B, D = 4, 32
    emb_i = jax.random.normal(k1, (B, D), dtype=jnp.float32)
    emb_j = jax.random.normal(k2, (B, D), dtype=jnp.float32)
    loss_small = jax.block_until_ready(
        ntxent_loss(emb_i, emb_j, temperature=temperature))
    ref_small = _reference_ntxent(emb_i, emb_j, temperature)
    assert jnp.allclose(loss_small, ref_small, rtol=1e-4, atol=1e-4), \
        (loss_small, ref_small)

    # --- moderate shape (N=320, not a tile multiple): exercises the tiled
    #     kernel including the zero-row padding path.  The f32-MXU run checks
    #     the algorithm tightly against the monolithic kernel; the default
    #     bf16-MXU run checks against the pure-JAX reference. ---------------- #
    B2, D2 = 160, 128
    ei2 = jax.random.normal(k3, (B2, D2), dtype=jnp.float32)
    ej2 = jax.random.normal(k4, (B2, D2), dtype=jnp.float32)

    loss_tiled_f32 = jax.block_until_ready(
        _ntxent_loss_tiled(ei2, ej2, temperature=temperature,
                           mm_dtype=jnp.float32))
    loss_mono = jax.block_until_ready(
        _ntxent_loss_small(ei2, ej2, temperature=temperature,
                           use_cosine_similarity=True))
    assert jnp.allclose(loss_tiled_f32, loss_mono, rtol=1e-3, atol=1e-3), \
        (loss_tiled_f32, loss_mono)

    loss_tiled_bf16 = jax.block_until_ready(
        _ntxent_loss_tiled(ei2, ej2, temperature=temperature))   # bf16 MXU default
    ref_big = _reference_ntxent(ei2, ej2, temperature)
    assert jnp.allclose(loss_tiled_bf16, ref_big, rtol=2e-2, atol=2e-2), \
        (loss_tiled_bf16, ref_big)

    print("KERNEL_OK")
</pallas_src>

<mosaic_0001>
module attributes {stable_mosaic.version = 11 : i64} {
  func.func @_ntxent_small_kernel(%arg0: memref<4x32xf32, #tpu.memory_space<vmem>>, %arg1: memref<4x32xf32, #tpu.memory_space<vmem>>, %arg2: memref<1x1xf32, #tpu.memory_space<vmem>>) attributes {dimension_semantics = [], scalar_prefetch = 0 : i64, scratch_operands = 0 : i64, tpu.core_type = #tpu.core_type<tc>} {
    %c0 = arith.constant 0 : index
    %c0_0 = arith.constant 0 : index
    %0 = vector.load %arg0[%c0, %c0_0] : memref<4x32xf32, #tpu.memory_space<vmem>>, vector<4x32xf32>
    %c0_1 = arith.constant 0 : index
    %c0_2 = arith.constant 0 : index
    %1 = vector.load %arg1[%c0_1, %c0_2] : memref<4x32xf32, #tpu.memory_space<vmem>>, vector<4x32xf32>
    %2 = arith.mulf %0, %0 : vector<4x32xf32>
    %cst = arith.constant dense<0.000000e+00> : vector<4xf32>
    %3 = vector.multi_reduction <add>, %2, %cst [1] : vector<4x32xf32> to vector<4xf32>
    %4 = vector.shape_cast %3 : vector<4xf32> to vector<4x1xf32>
    %cst_3 = arith.constant 1.000000e-16 : f32
    %5 = vector.broadcast %cst_3 : f32 to vector<4x1xf32>
    %6 = arith.maximumf %4, %5 : vector<4x1xf32>
    %7 = math.rsqrt %6 : vector<4x1xf32>
    %cst_4 = arith.constant 1.41421354 : f32
    %8 = vector.broadcast %cst_4 : f32 to vector<4x1xf32>
    %9 = arith.mulf %7, %8 : vector<4x1xf32>
    %10 = vector.broadcast %9 : vector<4x1xf32> to vector<4x32xf32>
    %11 = arith.mulf %0, %10 : vector<4x32xf32>
    %12 = arith.mulf %1, %1 : vector<4x32xf32>
    %cst_5 = arith.constant dense<0.000000e+00> : vector<4xf32>
    %13 = vector.multi_reduction <add>, %12, %cst_5 [1] : vector<4x32xf32> to vector<4xf32>
    %14 = vector.shape_cast %13 : vector<4xf32> to vector<4x1xf32>
    %cst_6 = arith.constant 1.000000e-16 : f32
    %15 = vector.broadcast %cst_6 : f32 to vector<4x1xf32>
    %16 = arith.maximumf %14, %15 : vector<4x1xf32>
    %17 = math.rsqrt %16 : vector<4x1xf32>
    %cst_7 = arith.constant 1.41421354 : f32
    %18 = vector.broadcast %cst_7 : f32 to vector<4x1xf32>
    %19 = arith.mulf %17, %18 : vector<4x1xf32>
    %20 = vector.broadcast %19 : vector<4x1xf32> to vector<4x32xf32>
    %21 = arith.mulf %1, %20 : vector<4x32xf32>
    %22 = arith.mulf %11, %21 : vector<4x32xf32>
    %cst_8 = arith.constant dense<0.000000e+00> : vector<4xf32>
    %23 = vector.multi_reduction <add>, %22, %cst_8 [1] : vector<4x32xf32> to vector<4xf32>
    %24 = vector.shape_cast %23 : vector<4xf32> to vector<4x1xf32>
    %25 = tpu.concatenate %24, %24 in 0 : vector<4x1xf32>, vector<4x1xf32> -> vector<8x1xf32>
    %26 = tpu.concatenate %11, %21 in 0 : vector<4x32xf32>, vector<4x32xf32> -> vector<8x32xf32>
    %cst_9 = arith.constant dense<0.000000e+00> : vector<8x8xf32>
    %27 = tpu.matmul %26, %26, %cst_9 {dimension_numbers = #tpu.dot_dimension_numbers<[1], [1], [0], [0], [0, 0, 1, 0], [], []>} : vector<8x32xf32>, vector<8x32xf32>, vector<8x8xf32> -> vector<8x8xf32>
    %28 = arith.mulf %26, %26 : vector<8x32xf32>
    %cst_10 = arith.constant dense<0.000000e+00> : vector<8xf32>
    %29 = vector.multi_reduction <add>, %28, %cst_10 [1] : vector<8x32xf32> to vector<8xf32>
    %30 = vector.shape_cast %29 : vector<8xf32> to vector<8x1xf32>
    %cst_11 = arith.constant 2.000000e+00 : f32
    %31 = vector.broadcast %cst_11 : f32 to vector<8x8xf32>
    %32 = arith.subf %27, %31 : vector<8x8xf32>
    %33 = math.exp %32 : vector<8x8xf32>
    %cst_12 = arith.constant dense<0.000000e+00> : vector<8xf32>
    %34 = vector.multi_reduction <add>, %33, %cst_12 [1] : vector<8x8xf32> to vector<8xf32>
    %35 = vector.shape_cast %34 : vector<8xf32> to vector<8x1xf32>
    %cst_13 = arith.constant 2.000000e+00 : f32
    %36 = vector.broadcast %cst_13 : f32 to vector<8x1xf32>
    %37 = arith.subf %30, %36 : vector<8x1xf32>
    %38 = math.exp %37 : vector<8x1xf32>
    %39 = arith.subf %35, %38 : vector<8x1xf32>
    %40 = math.log %39 : vector<8x1xf32>
    %cst_14 = arith.constant 2.000000e+00 : f32
    %41 = vector.broadcast %cst_14 : f32 to vector<8x1xf32>
    %42 = arith.addf %40, %41 : vector<8x1xf32>
    %43 = arith.subf %42, %25 : vector<8x1xf32>
    %cst_15 = arith.constant dense<0.000000e+00> : vector<1xf32>
    %44 = vector.multi_reduction <add>, %43, %cst_15 [0] : vector<8x1xf32> to vector<1xf32>
    %45 = vector.shape_cast %44 : vector<1xf32> to vector<1x1xf32>
    %cst_16 = arith.constant 1.250000e-01 : f32
    %46 = vector.broadcast %cst_16 : f32 to vector<1x1xf32>
    %47 = arith.mulf %45, %46 : vector<1x1xf32>
    %c0_17 = arith.constant 0 : index
    %c0_18 = arith.constant 0 : index
    %48 = vector.load %arg2[%c0_17, %c0_18] : memref<1x1xf32, #tpu.memory_space<vmem>>, vector<1x1xf32>
    tpu.vector_store %arg2[%c0_17, %c0_18], %47 {strides = array<i32>} : memref<1x1xf32, #tpu.memory_space<vmem>>, vector<1x1xf32>,
    return
  }
}

</mosaic_0001>

<bundles_post_ra>
// kernel: tpu_custom_call.1
= control target key start
LH: loop header
LB: loop body
LE: loop exit
PB: predicated region body
PF: predicated region fallthrough
CT: control target
= control target key end

     0   :  { %7 = vsyncpa [#allocation3], 0  ;;  %s314_s0 = inlined_call_operand.hbm [shape: f32[4,32], index: 0, kind: input, shape index: {}]   ;;  %s315_s1 = inlined_call_operand.hbm [shape: f32[4,32], index: 1, kind: input, shape index: {}]   ;;  %s316_s2 = inlined_call_operand.hbm [shape: f32[1,1], index: 2, kind: output, shape index: {}]  }
   0x1   :  { %8 = vsyncpa [#allocation6], 0 }
   0x2   :  { %9 = vsyncpa [#allocation4], 0  ;;  %s280_s9 = smov [#allocation2]   ;;  %s281_s11 = smov [#allocation5]  }
   0x3   :  { %s16_s10 = sshll.u32 %s280_s9, 4  ;;  %s26_s12 = sshll.u32 %s281_s11, 4  ;;  %s17_s10 = int_to_ptr.vmem [resolvable:$true] %s16_s10  ;;  %s27_s12 = int_to_ptr.vmem [resolvable:$true] %s26_s12 }
   0x4   :  { %s222_s13 = scalar_lea.vmem %s17_s10, 64  ;;  %p227_p1 = scmp.lt.s32.totalorder %s17_s10, %s17_s10 }
   0x5   :  { %p223_p0 = scmp.ne.s32.totalorder %s17_s10, %s222_s13  ;;  %p228_p2 = scmp.lt.s32.totalorder %s222_s13, %s222_s13 }
   0x7   :  { %p229_p3 = por %p228_p2, %p227_p1 }
   0x9   :  { %p230_p4 = pnand %p229_p3, %p223_p0 }
   0xb   :  { %233 = shalt.err (!%p230_p4)
}
   0xc   :  { %19 = dma.hbm_to_vmem [thread:$0]  %s314_s0, 64, %s17_s10, [#allocation3]  }
   0xd   :  { %s242_s16 = scalar_lea.vmem %s27_s12, 64  ;;  %p247_p6 = scmp.lt.s32.totalorder %s27_s12, %s27_s12 }
   0xe   :  { %p243_p5 = scmp.ne.s32.totalorder %s27_s12, %s242_s16  ;;  %p248_p7 = scmp.lt.s32.totalorder %s242_s16, %s242_s16 }
  0x10   :  { %p249_p8 = por %p248_p7, %p247_p6 }
  0x12   :  { %p250_p9 = pnand %p249_p8, %p243_p5 }
  0x14   :  { %253 = shalt.err (!%p250_p9)
}
  0x15   :  { %29 = dma.hbm_to_vmem [thread:$0]  %s315_s1, 64, %s27_s12, [#allocation6]  }
  0x16   :  { %274 = dma.done.wait [#allocation3], 64  }
  0x17   :  { %275 = vsyncadd [#allocation3], 4294967232 }
  0x18   :  { %276 = dma.done.wait [#allocation6], 64  }
  0x19   :  { %277 = vsyncadd [#allocation6], 4294967232  ;;  %v37_v0 = vld [vmem:[#allocation5] sm:$0xf]  ;;  %vm39_vm0 = vcmask 257024   ;;  %v282_v6 = vmov 0.0  }
  0x1a   :  { %v36_v1 = vld [vmem:[#allocation2] sm:$0xf]  ;;  %v47_v2 = vmul.f32 %v37_v0, %v37_v0  ;;  %194 = vmatprep.subr.mxu0 %v282_v6  ;;  %vm283_vm1 = vmmov 0   ;;  %vm62_vm2 = vcmask 1043456   ;;  %vm68_vm3 = vcmask 261120   ;;  %s284_s0 = smov [#allocation7]  }
  0x1b   :  { %v38_v3 = vmul.f32 %v36_v1, %v36_v1  ;;  %196 = vmatprep.mubr.msk.f32.mxu0 %vm283_vm1, %v282_v6  ;;  %vm149_vm4 = vcmask 64512   ;;  %vm161_vm5 = vcmask 7168   ;;  %s178_s1 = sshll.u32 %s284_s0, 4  ;;  %vm170_vm6 = vcmask 0   ;;  %s179_s1 = int_to_ptr.vmem [resolvable:$true] %s178_s1 }
  0x1c   :  { %v48_v4 = vsel %vm39_vm0, %v47_v2, 0.0  ;;  %s254_s19 = scalar_lea.vmem %s179_s1, 16  ;;  %s258_s20 = scalar_lea.vmem %s179_s1, 32 }
  0x1d   :  { %49 = vadd.xlane.f32.xlu0 %v48_v4  ;;  %v40_v5 = vsel %vm39_vm0, %v38_v3, 0.0  ;;  %p255_p10 = scmp.ne.s32.totalorder %s179_s1, %s254_s19  ;;  %p259_p11 = scmp.lt.s32.totalorder %s179_s1, %s179_s1 }
  0x1e   :  { %p260_p12 = scmp.lt.s32.totalorder %s258_s20, %s254_s19 }
  0x20   :  { %p261_p13 = por %p260_p12, %p259_p11 }
  0x21   :  { %41 = vadd.xlane.f32.xlu0 %v40_v5 }
  0x22   :  { %p262_p0 = pnand %p261_p13, %p255_p10 }
  0xa6   :  { %v50_v7 = vpop.xlane.xlu0 %49 }
  0xa7   :  { %v51_v8 = vmax.f32 %v50_v7, 1e-16 }
  0xa9   :  { %204 = vrsqrt.f32 %v51_v8 }
  0xaa   :  { %v42_v9 = vpop.xlane.xlu0 %41 }
  0xab   :  { %v43_v10 = vmax.f32 %v42_v9, 1e-16 }
  0xad   :  { %206 = vrsqrt.f32 %v43_v10 }
  0xb6   :  { %v205_v11 = vpop.eup %204 }
  0xb7   :  { %v53_v12 = vmul.f32 1.4142135, %v205_v11 }
  0xb9   :  { %v54_v13 = vmul.f32 %v53_v12, %v37_v0 }
  0xba   :  { %v207_v14 = vpop.eup %206 }
  0xbb   :  { %v45_v15 = vmul.f32 1.4142135, %v207_v14  ;;  %v65_v17 = vrot.slane %v54_v13, 4 }
  0xbd   :  { %v46_v16 = vmul.f32 %v45_v15, %v36_v1 }
  0xbf   :  { %v67_v18 = vsel %vm62_vm2, %v46_v16, %v65_v17  ;;  %v55_v19 = vmul.f32 %v54_v13, %v46_v16 }
  0xc0   :  { %195 = vmatpush3.xpose.msk.msra.mxu0 %vm68_vm3, %v67_v18  ;;  %v142_v20 = vmul.f32 %v67_v18, %v67_v18 }
  0xc1   :  { %v56_v21 = vsel %vm39_vm0, %v55_v19, 0.0 }
  0xc2   :  { %57 = vadd.xlane.f32.xlu0 %v56_v21  ;;  %v143_v22 = vsel %vm68_vm3, %v142_v20, 0.0 }
  0xc3   :  { %144 = vadd.xlane.f32.xlu1 %v143_v22  ;;  %197 = vmatmul.mubr.msk.f32.vlgmr.msra.gmra.mxu0 %vm68_vm3, %v67_v18 }
 0x14b   :  { %v58_v35 = vpop.xlane.xlu0 %57 }
 0x14c   :  { %v145_v29 = vpop.xlane.xlu1 %144  ;;  %v60_v37 = vrot.slane %v58_v35, 4 }
 0x14d   :  { %v191_v30 = vadd.f32 -2.0, %v145_v29 }
 0x14e   :  { %v63_v40 = vsel %vm62_vm2, %v58_v35, %v60_v37 }
 0x14f   :  { %v154_v31 = vmul.f32 1.442695, %v191_v30 }
 0x183   :  { %v138_v23 = vpop.f32.mrf.mxu0 }
 0x184   :  { %v190_v24 = vadd.f32 -2.0, %v138_v23 }
 0x185   :  { %v198_v25 = vpop.f32.mrf.mxu0 }
 0x186   :  { %v147_v26 = vmul.f32 1.442695, %v190_v24 }
 0x188   :  { %208 = vpow2.f32 %v147_v26 }
 0x189   :  { %210 = vpow2.f32 %v154_v31 }
 0x195   :  { %v209_v27 = vpop.eup %208 }
 0x196   :  { %v150_v28 = vsel %vm149_vm4, %v209_v27, 0.0  ;;  %v211_v32 = vpop.eup %210 }
 0x197   :  { %151 = vadd.xlane.f32.xlu1 %v150_v28 }
 0x220   :  { %v152_v33 = vpop.xlane.xlu1 %151 }
 0x221   :  { %v156_v34 = vsub.f32 %v152_v33, %v211_v32 }
 0x223   :  { %212 = vlog2.f32 %v156_v34 }
 0x230   :  { %v213_v36 = vpop.eup %212 }
 0x231   :  { %v158_v38 = vmul.f32 0.6931472, %v213_v36 }
 0x233   :  { %v159_v39 = vadd.f32 2.0, %v158_v38 }
 0x235   :  { %v160_v41 = vsub.f32 %v159_v39, %v63_v40 }
 0x237   :  { %v162_v42 = vsel %vm161_vm5, %v160_v41, 0.0 }
 0x238   :  { %v163_v43 = vrot.slane %v162_v42, 4 }
 0x23a   :  { %v164_v44 = vadd.f32 %v163_v43, %v162_v42 }
 0x23c   :  { %v165_v45 = vrot.slane %v164_v44, 2 }
 0x23e   :  { %v166_v46 = vadd.f32 %v165_v45, %v164_v44 }
 0x240   :  { %v167_v47 = vrot.slane %v166_v46, 1 }
 0x242   :  { %v168_v48 = vadd.f32 %v167_v47, %v166_v46 }
 0x244   :  { %v169_v49 = vmul.f32 0.125, %v168_v48 }
 0x246   :  { %171 = vst.msk [vmem:[#allocation7] sm:$0x1] %vm170_vm6, %v169_v49 }
 0x247   :  { %265 = shalt.err (!%p262_p0)
}
 0x248   :  { %181 = dma.vmem_to_hbm [thread:$0]  %s179_s1, 16, %s316_s2, [#allocation4]  }
 0x249   :  { %278 = dma.done.wait [#allocation4], 16  }
 0x24a   :  { %279 = vsyncadd [#allocation4], 4294967280 }
 0x24b   :  { %185 = vsyncpa [#allocation3], 1 }
 0x24c   :  { %186 = vsyncpa [#allocation6], 1 }
 0x24d   :  { %187 = vsyncpa [#allocation4], 1 }

</bundles_post_ra>
